<compile_context>
chip_gen: v5e
topology: v5e:2x2
jax: 0.10.0
libtpu: 0.0.40
codegen_flags: <defaults>
</compile_context>

<pallas_src>
import functools

import jax
import jax.numpy as jnp
from jax.experimental import pallas as pl
from jax.experimental.pallas import tpu as pltpu

_SUBLANE = 8       # sublane width (second-to-last dim tiling granularity)
_MAX_TB = 2048     # max batch tile (x tile = 512 KiB f32; ~1 MiB double-buffered)


def _round_up(n, m):
    return ((n + m - 1) // m) * m


def prepare_controller_params(weight, bias, compute_dtype=None):
    """One-time parameter prep (init time, NOT per forward call).

    weight: [action_dim, in_features]  (PyTorch nn.Linear layout)
    bias:   [action_dim]
    Returns (w_t [in_features, action_dim], bias2d [1, action_dim]).
    If compute_dtype is given (e.g. bf16 on v6e/v7x), the weight is stored in
    that dtype so no per-grid-step cast happens in the kernel.  Keep None (f32)
    on v5e.
    """
    action_dim, in_features = weight.shape
    w_t = jnp.asarray(weight).T
    if compute_dtype is not None:
        w_t = w_t.astype(compute_dtype)
    b2d = jnp.asarray(bias).reshape(1, action_dim).astype(jnp.float32)
    return w_t, b2d


def _controller_kernel(x_ref, w_ref, b_ref, o_ref, *, compute_dtype):
    # x_ref: [tb, F_in]  w_ref: [F_in, A]  b_ref: [1, A]  o_ref: [tb, A]
    x = x_ref[...]
    if compute_dtype is not None:
        x = x.astype(compute_dtype)      # weight already stored in compute_dtype
    z = jnp.dot(x, w_ref[...], preferred_element_type=jnp.float32)
    z = z + b_ref[...]                   # f32 bias broadcast over batch rows
    o_ref[...] = jnp.tanh(z).astype(o_ref.dtype)   # tanh goes to the EUP


def controller_forward(x, w_t, bias2d, *, tb=None, compute_dtype=None):
    """Pallas equivalent of Controller.forward: tanh(x @ W.T + b).

    x:      [B, latent_dim + hidden_dim]
    w_t:    [in_features, action_dim]   (from prepare_controller_params)
    bias2d: [1, action_dim]
    returns [B, action_dim]
    """
    B, f_in = x.shape
    f_in_w, action_dim = w_t.shape
    assert f_in == f_in_w, (f_in, f_in_w)

    # Batch tile: large enough to amortize the ~0.35us/step overhead, but small
    # enough that large batches still give >= 2 grid steps (v7x megacore).
    if tb is None:
        tb = min(_MAX_TB, _round_up(pl.cdiv(max(B, 1), 2), _SUBLANE))
    else:
        tb = _round_up(max(int(tb), 1), _SUBLANE)

    if B <= tb:
        tb = B                      # single block == full batch, no ragged edge
    grid = (pl.cdiv(B, tb),)

    kernel = functools.partial(_controller_kernel, compute_dtype=compute_dtype)
    return pl.pallas_call(
        kernel,
        out_shape=jax.ShapeDtypeStruct((B, action_dim), x.dtype),
        grid=grid,
        in_specs=[
            pl.BlockSpec((tb, f_in), lambda i: (i, 0)),          # x tile, pipelined over B
            pl.BlockSpec((f_in, action_dim), lambda i: (0, 0)),  # weight resident in VMEM
            pl.BlockSpec((1, action_dim), lambda i: (0, 0)),     # bias resident in VMEM
        ],
        out_specs=pl.BlockSpec((tb, action_dim), lambda i: (i, 0)),
        compiler_params=pltpu.CompilerParams(
            dimension_semantics=("parallel",),   # shard batch tiles across TCs (v7x)
        ),
    )(x, w_t, bias2d)


if __name__ == "__main__":
    # Shapes consistent with the module: latent_dim=32, hidden_dim=32,
    # action_dim=8, batch=2.
    latent_dim, hidden_dim, action_dim = 32, 32, 8
    in_features = latent_dim + hidden_dim
    batch = 2

    key = jax.random.PRNGKey(0)
    kx, kw, kb, kx2 = jax.random.split(key, 4)

    # Deterministic parameter init (mimics PyTorch Linear's U(-1/sqrt(fan_in), ...)).
    bound = 1.0 / jnp.sqrt(jnp.float32(in_features))
    weight = jax.random.uniform(kw, (action_dim, in_features),
                                minval=-bound, maxval=bound, dtype=jnp.float32)
    bias = jax.random.uniform(kb, (action_dim,),
                              minval=-bound, maxval=bound, dtype=jnp.float32)

    # One-time param prep (transpose, bias reshape) — hoisted out of the forward path.
    w_t, bias2d = prepare_controller_params(weight, bias)

    # --- Case 1: tiny batch (B=2), single grid step, block == full array. ---
    x = jax.random.normal(kx, (batch, in_features), dtype=jnp.float32)
    out = jax.block_until_ready(controller_forward(x, w_t, bias2d))
    ref = jnp.tanh(x @ weight.T + bias)
    assert out.shape == (batch, action_dim)
    assert jnp.allclose(out, ref, atol=1e-5, rtol=1e-5)

    # --- Case 2: ragged multi-step grid (B=33, tb=8 -> 5 steps, trailing block masked). ---
    batch2 = 33
    x2 = jax.random.normal(kx2, (batch2, in_features), dtype=jnp.float32)
    out2 = jax.block_until_ready(controller_forward(x2, w_t, bias2d, tb=8))
    ref2 = jnp.tanh(x2 @ weight.T + bias)
    assert out2.shape == (batch2, action_dim)
    assert jnp.allclose(out2, ref2, atol=1e-5, rtol=1e-5)

    # --- Case 3: default tile heuristic on a larger batch (2 grid steps / megacore). ---
    batch3 = 4096
    x3 = jax.random.normal(kx, (batch3, in_features), dtype=jnp.float32)
    out3 = jax.block_until_ready(controller_forward(x3, w_t, bias2d))
    ref3 = jnp.tanh(x3 @ weight.T + bias)
    assert out3.shape == (batch3, action_dim)
    assert jnp.allclose(out3, ref3, atol=1e-5, rtol=1e-5)

    print("KERNEL_OK")
</pallas_src>

<mosaic_0001>
module attributes {stable_mosaic.version = 11 : i64} {
  func.func @_controller_kernel(%arg0: i32, %arg1: memref<2x64xf32, #tpu.memory_space<vmem>>, %arg2: memref<64x8xf32, #tpu.memory_space<vmem>>, %arg3: memref<1x8xf32, #tpu.memory_space<vmem>>, %arg4: memref<2x8xf32, #tpu.memory_space<vmem>>) attributes {dimension_semantics = [#tpu.dimension_semantics<parallel>], iteration_bounds = array<i64: 1>, scalar_prefetch = 0 : i64, scratch_operands = 0 : i64, tpu.core_type = #tpu.core_type<tc>, window_params = [{transform_indices = @transform_0, window_bounds = array<i64: 2, 64>}, {pipeline_mode = #tpu.pipeline_mode<synchronous>, transform_indices = @transform_1, window_bounds = array<i64: 64, 8>}, {pipeline_mode = #tpu.pipeline_mode<synchronous>, transform_indices = @transform_2, window_bounds = array<i64: 1, 8>}, {transform_indices = @transform_3, window_bounds = array<i64: 2, 8>}]} {
    %c0 = arith.constant 0 : index
    %c0_0 = arith.constant 0 : index
    %0 = vector.load %arg1[%c0, %c0_0] : memref<2x64xf32, #tpu.memory_space<vmem>>, vector<2x64xf32>
    %c0_1 = arith.constant 0 : index
    %c0_2 = arith.constant 0 : index
    %1 = vector.load %arg2[%c0_1, %c0_2] : memref<64x8xf32, #tpu.memory_space<vmem>>, vector<64x8xf32>
    %cst = arith.constant dense<0.000000e+00> : vector<2x8xf32>
    %2 = tpu.matmul %0, %1, %cst {dimension_numbers = #tpu.dot_dimension_numbers<[1], [0], [0], [1], [0, 0, 1, 1], [], []>} : vector<2x64xf32>, vector<64x8xf32>, vector<2x8xf32> -> vector<2x8xf32>
    %c0_3 = arith.constant 0 : index
    %c0_4 = arith.constant 0 : index
    %3 = vector.load %arg3[%c0_3, %c0_4] : memref<1x8xf32, #tpu.memory_space<vmem>>, vector<1x8xf32>
    %4 = vector.broadcast %3 : vector<1x8xf32> to vector<2x8xf32>
    %5 = arith.addf %2, %4 : vector<2x8xf32>
    %6 = math.tanh %5 : vector<2x8xf32>
    %c0_5 = arith.constant 0 : index
    %c0_6 = arith.constant 0 : index
    %7 = vector.load %arg4[%c0_5, %c0_6] : memref<2x8xf32, #tpu.memory_space<vmem>>, vector<2x8xf32>
    tpu.vector_store %arg4[%c0_5, %c0_6], %6 {strides = array<i32>} : memref<2x8xf32, #tpu.memory_space<vmem>>, vector<2x8xf32>,
    return
  }
  func.func @transform_0(%arg0: i32) -> (i32, i32) {
    %c0_i32 = arith.constant 0 : i32
    %c0_i32_0 = arith.constant 0 : i32
    return %arg0, %c0_i32 : i32, i32
  }
  func.func @transform_1(%arg0: i32) -> (i32, i32) {
    %c0_i32 = arith.constant 0 : i32
    %c0_i32_0 = arith.constant 0 : i32
    %c0_i32_1 = arith.constant 0 : i32
    return %c0_i32, %c0_i32_0 : i32, i32
  }
  func.func @transform_2(%arg0: i32) -> (i32, i32) {
    %c0_i32 = arith.constant 0 : i32
    %c0_i32_0 = arith.constant 0 : i32
    %c0_i32_1 = arith.constant 0 : i32
    return %c0_i32, %c0_i32_0 : i32, i32
  }
  func.func @transform_3(%arg0: i32) -> (i32, i32) {
    %c0_i32 = arith.constant 0 : i32
    %c0_i32_0 = arith.constant 0 : i32
    return %arg0, %c0_i32 : i32, i32
  }
}

</mosaic_0001>

<bundles_post_ra>
// kernel: tpu_custom_call.1
= control target key start
LH: loop header
LB: loop body
LE: loop exit
PB: predicated region body
PF: predicated region fallthrough
CT: control target
= control target key end

     0   :  { %s156_s0 = inlined_call_operand.vmem [shape: f32[2,64], index: 0, kind: input, shape index: {}]   ;;  %s157_s1 = inlined_call_operand.vmem [shape: f32[64,8], index: 1, kind: input, shape index: {}]   ;;  %s158_s2 = inlined_call_operand.vmem [shape: f32[1,8], index: 2, kind: input, shape index: {}]   ;;  %s159_s3 = inlined_call_operand.hbm [shape: f32[2,8], index: 3, kind: output, shape index: {}]  }
   0x1   :  { %v23_v0 = vld [vmem:[%s157_s1 + $0x38] sm:$0xff]  ;;  %v22_v1 = vld [vmem:[%s157_s1 + $0x30] sm:$0xff]  ;;  %v21_v2 = vld [vmem:[%s157_s1 + $0x28] sm:$0xff] }
   0x2   :  { %40 = vmatpush.msra.mxu0 %v23_v0 }
   0x4   :  { %41 = vmatpush.msra.mxu0 %v22_v1 }
   0x5   :  { %8 = vsyncpa [#allocation3], 0  ;;  %v20_v3 = vld [vmem:[%s157_s1 + $0x20] sm:$0xff]  ;;  %v19_v4 = vld [vmem:[%s157_s1 + $0x18] sm:$0xff]  ;;  %vm28_vm0 = vcmask 523264   ;;  %s102_s5 = smov [#allocation2]  }
   0x6   :  { %42 = vmatpush.msra.mxu0 %v21_v2  ;;  %v18_v5 = vld [vmem:[%s157_s1 + $0x10] sm:$0xff]  ;;  %v17_v6 = vld [vmem:[%s157_s1 + $0x8] sm:$0xff]  ;;  %v16_v7 = vld [vmem:[%s157_s1] sm:$0xff]  ;;  %s60_s6 = sshll.u32 %s102_s5, 4  ;;  %s62_s1 = sshll.u32 %s159_s3, 4  ;;  %vm53_vm1 = vcmask 58368   ;;  %s61_s6 = int_to_ptr.vmem [resolvable:$true] %s60_s6  ;;  %s63_s1 = int_to_ptr.hbm [resolvable:$true] %s62_s1 }
   0x7   :  { %v15_v8 = vld [vmem:[%s156_s0] sm:$0x3] }
   0x8   :  { %43 = vmatpush.msra.mxu0 %v20_v3  ;;  %v73_v9 = vld [vmem:[%s158_s2] ss:$0 sm:$0xff] }
   0xa   :  { %44 = vmatpush.msra.mxu0 %v19_v4 }
   0xc   :  { %45 = vmatpush.msra.mxu0 %v18_v5 }
   0xe   :  { %46 = vmatpush.msra.mxu0 %v17_v6 }
  0x10   :  { %47 = vmatpush.msra.mxu0 %v16_v7 }
  0x11   :  { %71 = vmatmul.msk.f32.vlgmr.msra.gmra.mxu0 %vm28_vm0, %v15_v8 }
  0x8e   :  { %v49_v10 = vpop.f32.mrf.mxu0 }
  0x8f   :  { %v50_v11 = vadd.f32 %v73_v9, %v49_v10 }
  0x91   :  { %74 = vtanh.f32 %v50_v11 }
  0x97   :  { %v75_v12 = vpop.eup %74 }
  0x98   :  { %54 = vst.msk [vmem:[#allocation2] sm:$0x3] %vm53_vm1, %v75_v12 }
  0x99   :  { %65 = dma.vmem_to_hbm [thread:$0]  %s61_s6, 32, %s63_s1, [#allocation3]  }
  0x9a   :  { %100 = dma.done.wait [#allocation3], 32  }
  0x9b   :  { %101 = vsyncadd [#allocation3], 4294967264 }
  0x9c   :  { %70 = vsyncpa [#allocation3], 1 }

</bundles_post_ra>
